<compile_context>
chip_gen: v6e
topology: v6e:2x2x1
jax: 0.10.0
libtpu: 0.0.40
codegen_flags: <defaults>
</compile_context>

<pallas_src>
import jax
import jax.numpy as jnp
from jax.experimental import pallas as pl
from jax.experimental.pallas import tpu as pltpu

IN = 4          # fc3 in_features
OUT = 3         # fc3 out_features
SLOTS = 4       # per-sample lane slots (OUT padded to IN so 32 samples / row)
LANE = 128      # TPU lane width
GROUPS = LANE // SLOTS          # 32 samples per 128-lane row
TILE_R_MAX = 8192               # max rows per grid step (4 MiB/buffer)
SMALL_ROWS = 64                 # < 64 rows (2048 samples) -> grid-free path


def linear_relu_kernel(m_ref, b_ref, x_ref, o_ref):
    """relu(x @ M + b) on packed, lane-dense tiles.

    m_ref: VMEM [128, 128]  block-diagonal: 32 copies of W^T (4x4, last col 0)
    b_ref: VMEM [1, 128]    bias replicated per 4-lane sample group
    x_ref: VMEM [TR, 128]   lane l = sample (32*r + l//4), feature (l % 4)
    o_ref: VMEM [TR, 128]   lane l = sample (32*r + l//4), output  (l % 4);
                            slot 3 of every sample group is zero padding.
    """
    y = jnp.dot(x_ref[...], m_ref[...],
                preferred_element_type=jnp.float32,
                precision=jax.lax.Precision.HIGHEST)
    o_ref[...] = jnp.maximum(y + b_ref[...], 0.0)


def _round_up(n, m):
    return ((n + m - 1) // m) * m


def net_forward(x, w, b):
    """x: [B, 4] f32, w: [3, 4] f32 (PyTorch fc3.weight layout), b: [3] f32."""
    B, in_features = x.shape
    assert in_features == IN and w.shape == (OUT, IN) and b.shape == (OUT,)
    x = x.astype(jnp.float32)
    w = w.astype(jnp.float32)
    b = b.astype(jnp.float32)

    # One-time parameter prep (64 KiB, stays VMEM-resident across the grid):
    #   w4[k, j] = W[j, k] for j < OUT, zero in the padding slot j == 3.
    w4 = jnp.zeros((IN, SLOTS), jnp.float32).at[:, :OUT].set(w.T)
    m = jnp.kron(jnp.eye(GROUPS, dtype=jnp.float32), w4)              # [128,128]
    b_lane = jnp.tile(jnp.pad(b, (0, SLOTS - OUT)), GROUPS)[None, :]  # [1,128]

    # Zero-copy packing: [B,4] -> [rows,128].  Pure bitcast (no HBM pass) when
    # B % 32 == 0; otherwise one tiny pad copy of <32 samples' worth of slack.
    n_flat = B * IN
    rows = pl.cdiv(n_flat, LANE)
    small = rows < SMALL_ROWS
    rows_alloc = _round_up(rows, 8) if small else rows   # sublane-align tiny slabs
    pad = rows_alloc * LANE - n_flat
    flat = x.reshape(-1)
    if pad:
        flat = jnp.pad(flat, (0, pad))
    x2 = flat.reshape(rows_alloc, LANE)

    if small:
        # Tiny batch: grid-free call, no pipelining scaffolding at all.
        y = pl.pallas_call(
            linear_relu_kernel,
            out_shape=jax.ShapeDtypeStruct((rows_alloc, LANE), jnp.float32),
            in_specs=[
                pl.BlockSpec(memory_space=pltpu.MemorySpace.VMEM),
                pl.BlockSpec(memory_space=pltpu.MemorySpace.VMEM),
                pl.BlockSpec(memory_space=pltpu.MemorySpace.VMEM),
            ],
            out_specs=pl.BlockSpec(memory_space=pltpu.MemorySpace.VMEM),
        )(m, b_lane, x2)
    else:
        # Streaming path: big tiles (amortize the ~0.35 us/step overhead),
        # >= 2 grid steps so both v7x TensorCores get work, ragged last block
        # (no zero-fill up to a tile multiple), W/b resident across the grid.
        tile_r = min(TILE_R_MAX, max(8, _round_up(pl.cdiv(rows_alloc, 2), 8)))
        grid = (pl.cdiv(rows_alloc, tile_r),)
        y = pl.pallas_call(
            linear_relu_kernel,
            out_shape=jax.ShapeDtypeStruct((rows_alloc, LANE), jnp.float32),
            grid=grid,
            in_specs=[
                pl.BlockSpec((LANE, LANE), lambda i: (0, 0)),   # M: resident
                pl.BlockSpec((1, LANE), lambda i: (0, 0)),      # bias: resident
                pl.BlockSpec((tile_r, LANE), lambda i: (i, 0)),
            ],
            out_specs=pl.BlockSpec((tile_r, LANE), lambda i: (i, 0)),
            compiler_params=pltpu.CompilerParams(
                dimension_semantics=("parallel",),   # shard tiles across TCs
            ),
        )(m, b_lane, x2)

    # Unpack: [rows,128] is exactly [rows*32, 4] in flat order; drop the
    # padding slot and padded samples to honour the module's [B, 3] contract.
    return y.reshape(-1, SLOTS)[:B, :OUT]


if __name__ == "__main__":
    key = jax.random.PRNGKey(0)
    kw, kb, k1, k2, k3 = jax.random.split(key, 5)

    # Deterministic parameters with nn.Linear(4, 3) shapes (PyTorch layout).
    w = jax.random.normal(kw, (OUT, IN), dtype=jnp.float32) * 0.5   # fc3.weight
    b = jax.random.normal(kb, (OUT,), dtype=jnp.float32) * 0.1      # fc3.bias

    fwd = jax.jit(net_forward)

    def ref(x):
        # Exact f32 reference (elementwise multiply-accumulate, no MXU).
        return jnp.maximum(jnp.sum(x[:, None, :] * w[None, :, :], axis=-1) + b, 0.0)

    # Tiny batch -> grid-free path.
    x_small = jax.random.normal(k1, (8, IN), dtype=jnp.float32)
    out_small = jax.block_until_ready(fwd(x_small, w, b))
    assert out_small.shape == (8, OUT)
    assert jnp.allclose(out_small, ref(x_small), atol=1e-4, rtol=1e-4)

    # Batch not a multiple of 32 -> exercises the (tiny) pad path.
    x_med = jax.random.normal(k2, (300, IN), dtype=jnp.float32)
    out_med = jax.block_until_ready(fwd(x_med, w, b))
    assert out_med.shape == (300, OUT)
    assert jnp.allclose(out_med, ref(x_med), atol=1e-4, rtol=1e-4)

    # Medium batch -> gridded "parallel" path with a ragged last block.
    x_big = jax.random.normal(k3, (2432, IN), dtype=jnp.float32)
    out_big = jax.block_until_ready(fwd(x_big, w, b))
    assert out_big.shape == (2432, OUT)
    assert jnp.allclose(out_big, ref(x_big), atol=1e-4, rtol=1e-4)

    print("KERNEL_OK")
</pallas_src>

<mosaic_0001>
module attributes {stable_mosaic.version = 11 : i64} {
  func.func @linear_relu_kernel(%arg0: memref<128x128xf32, #tpu.memory_space<vmem>>, %arg1: memref<1x128xf32, #tpu.memory_space<vmem>>, %arg2: memref<8x128xf32, #tpu.memory_space<vmem>>, %arg3: memref<8x128xf32, #tpu.memory_space<vmem>>) attributes {dimension_semantics = [], scalar_prefetch = 0 : i64, scratch_operands = 0 : i64, tpu.core_type = #tpu.core_type<tc>} {
    %c0 = arith.constant 0 : index
    %c0_0 = arith.constant 0 : index
    %0 = vector.load %arg2[%c0, %c0_0] : memref<8x128xf32, #tpu.memory_space<vmem>>, vector<8x128xf32>
    %c0_1 = arith.constant 0 : index
    %c0_2 = arith.constant 0 : index
    %1 = vector.load %arg0[%c0_1, %c0_2] : memref<128x128xf32, #tpu.memory_space<vmem>>, vector<128x128xf32>
    %cst = arith.constant dense<0.000000e+00> : vector<8x128xf32>
    %2 = tpu.matmul %0, %1, %cst {dimension_numbers = #tpu.dot_dimension_numbers<[1], [0], [0], [1], [0, 0, 1, 1], [], []>, precision = #tpu.contract_precision<fp32>} : vector<8x128xf32>, vector<128x128xf32>, vector<8x128xf32> -> vector<8x128xf32>
    %c0_3 = arith.constant 0 : index
    %c0_4 = arith.constant 0 : index
    %3 = vector.load %arg1[%c0_3, %c0_4] : memref<1x128xf32, #tpu.memory_space<vmem>>, vector<1x128xf32>
    %4 = vector.broadcast %3 : vector<1x128xf32> to vector<8x128xf32>
    %5 = arith.addf %2, %4 : vector<8x128xf32>
    %cst_5 = arith.constant 0.000000e+00 : f32
    %6 = vector.broadcast %cst_5 : f32 to vector<8x128xf32>
    %7 = arith.maximumf %5, %6 : vector<8x128xf32>
    %c0_6 = arith.constant 0 : index
    %c0_7 = arith.constant 0 : index
    %8 = vector.load %arg3[%c0_6, %c0_7] : memref<8x128xf32, #tpu.memory_space<vmem>>, vector<8x128xf32>
    tpu.vector_store %arg3[%c0_6, %c0_7], %7 {strides = array<i32>} : memref<8x128xf32, #tpu.memory_space<vmem>>, vector<8x128xf32>,
    return
  }
}

</mosaic_0001>

<bundles_post_ra>
// kernel: tile.8
= control target key start
LH: loop header
LB: loop body
LE: loop exit
PB: predicated region body
PF: predicated region fallthrough
CT: control target
= control target key end

     0   :  { %s40_s0 = inlined_call_operand.vmem [shape: f32[4], index: 0, kind: input, shape index: {}]   ;;  %s41_s1 = inlined_call_operand.vmem [shape: f32[32,4], index: 1, kind: output, shape index: {}]  }
   0x1   :  { %v4_v0 = vld [vmem:[%s40_s0] ss:$0 sm:$0xff] }
   0x2   :  { %5 = vst [vmem:[%s41_s1] sm:$0xff] %v4_v0  ;;  %12 = vst [vmem:[%s41_s1 + $0x8] sm:$0xff] %v4_v0 }
   0x3   :  { %13 = vst [vmem:[%s41_s1 + $0x10] sm:$0xff] %v4_v0  ;;  %14 = vst [vmem:[%s41_s1 + $0x18] sm:$0xff] %v4_v0 }

// kernel: tile.9
= control target key start
LH: loop header
LB: loop body
LE: loop exit
PB: predicated region body
PF: predicated region fallthrough
CT: control target
= control target key end

     0   :  { %s261_s10 = smov 124   ;;  %s262_s11 = smov 116   ;;  %vm3_vm0 = vcmask 31744   ;;  %vm9_vm1 = vcmask 1048544   ;;  %vm15_vm2 = vcmask 1015744   ;;  %vm21_vm3 = vcmask 982944   ;;  %s401_s0 = inlined_call_operand.vmem [shape: f32[32,4], index: 0, kind: input, shape index: {}]   ;;  %s402_s1 = inlined_call_operand.vmem [shape: f32[1,128], index: 1, kind: output, shape index: {}]  }
   0x1   :  { %v199_v0 = vld [vmem:[%s401_s0 + $0x1f] sm:$0x1]   ;;  %v201_v1 = vld [vmem:[%s401_s0 + $0x1d] sm:$0x1]   ;;  %v200_v2 = vld [vmem:[%s401_s0 + $0x1e] sm:$0x1]  }
   0x2   :  { %7 = vrot.lane.b32.xlu0 %v199_v0, %s261_s10  ;;  %19 = vrot.lane.b32.xlu1 %v201_v1, %s262_s11  ;;  %v202_v3 = vld [vmem:[%s401_s0 + $0x1c] sm:$0x1]   ;;  %s263_s16 = smov 120   ;;  %s264_s17 = smov 112   ;;  %v203_v4 = vld [vmem:[%s401_s0 + $0x1b] sm:$0x1]  }
   0x3   :  { %v204_v5 = vld [vmem:[%s401_s0 + $0x1a] sm:$0x1]   ;;  %s265_s22 = smov 108   ;;  %s266_s23 = smov 104   ;;  %v205_v6 = vld [vmem:[%s401_s0 + $0x19] sm:$0x1]  }
   0x4   :  { %v206_v7 = vld [vmem:[%s401_s0 + $0x18] sm:$0x1]   ;;  %s267_s28 = smov 100   ;;  %s268_s29 = smov 96   ;;  %v207_v8 = vld [vmem:[%s401_s0 + $0x17] sm:$0x1]  }
   0x5   :  { %v208_v9 = vld [vmem:[%s401_s0 + $0x16] sm:$0x1]   ;;  %v2_v10 = vld [vmem:[%s401_s0] sm:$0x1]   ;;  %s269_s7 = smov 92   ;;  %s270_s8 = smov 88  }
   0x6   :  { %13 = vrot.lane.b32.xlu0 %v200_v2, %s263_s16  ;;  %25 = vrot.lane.b32.xlu1 %v202_v3, %s264_s17  ;;  %4 = vst.msk [vmem:[#allocation0] sm:$0x1] %vm3_vm0, %v2_v10   ;;  %v209_v11 = vld [vmem:[%s401_s0 + $0x15] sm:$0x1]   ;;  %v210_v12 = vld [vmem:[%s401_s0 + $0x14] sm:$0x1]  }
   0x7   :  { %s271_s13 = smov 84   ;;  %s272_s14 = smov 80   ;;  %v211_v13 = vld [vmem:[%s401_s0 + $0x13] sm:$0x1]   ;;  %v212_v14 = vld [vmem:[%s401_s0 + $0x12] sm:$0x1]  }
   0x8   :  { %s273_s19 = smov 76   ;;  %s274_s20 = smov 72   ;;  %v213_v15 = vld [vmem:[%s401_s0 + $0x11] sm:$0x1]   ;;  %v214_v16 = vld [vmem:[%s401_s0 + $0x10] sm:$0x1]  }
   0x9   :  { %s275_s25 = smov 68   ;;  %s276_s26 = smov 64   ;;  %v215_v17 = vld [vmem:[%s401_s0 + $0xf] sm:$0x1]   ;;  %v216_v18 = vld [vmem:[%s401_s0 + $0xe] sm:$0x1]  }
   0xa   :  { %31 = vrot.lane.b32.xlu0 %v203_v4, %s265_s22  ;;  %37 = vrot.lane.b32.xlu1 %v204_v5, %s266_s23  ;;  %s277_s2 = smov 60   ;;  %s278_s3 = smov 56   ;;  %v217_v19 = vld [vmem:[%s401_s0 + $0xd] sm:$0x1]   ;;  %v218_v20 = vld [vmem:[%s401_s0 + $0xc] sm:$0x1]  }
   0xb   :  { %s280_s9 = smov 48   ;;  %v219_v21 = vld [vmem:[%s401_s0 + $0xb] sm:$0x1]   ;;  %v220_v22 = vld [vmem:[%s401_s0 + $0xa] sm:$0x1]   ;;  %s282_s15 = smov 40  }
   0xc   :  { %v221_v23 = vld [vmem:[%s401_s0 + $0x9] sm:$0x1]   ;;  %v222_v24 = vld [vmem:[%s401_s0 + $0x8] sm:$0x1]   ;;  %s284_s21 = smov 32   ;;  %s286_s27 = smov 24  }
   0xd   :  { %v223_v25 = vld [vmem:[%s401_s0 + $0x7] sm:$0x1]   ;;  %v224_v26 = vld [vmem:[%s401_s0 + $0x6] sm:$0x1]   ;;  %v225_v27 = vld [vmem:[%s401_s0 + $0x5] sm:$0x1]  }
   0xe   :  { %43 = vrot.lane.b32.xlu0 %v205_v6, %s267_s28  ;;  %49 = vrot.lane.b32.xlu1 %v206_v7, %s268_s29  ;;  %v226_v28 = vld [vmem:[%s401_s0 + $0x4] sm:$0x1]   ;;  %s288_s4 = smov 16   ;;  %v227_v29 = vld [vmem:[%s401_s0 + $0x3] sm:$0x1]   ;;  %s290_s10 = smov 8  }
   0xf   :  { %v228_v30 = vld [vmem:[%s401_s0 + $0x2] sm:$0x1]   ;;  %v229_v31 = vld [vmem:[%s401_s0 + $0x1] sm:$0x1]   ;;  %s291_s0 = smov 4   ;;  %vm27_vm4 = vcmask 950144  }
  0x10   :  { %vm33_vm5 = vcmask 917344   ;;  %vm39_vm6 = vcmask 884544   ;;  %vm45_vm7 = vcmask 851744   ;;  %vm51_vm8 = vcmask 818944  }
  0x11   :  { %vm57_vm9 = vcmask 786144   ;;  %vm63_vm10 = vcmask 753344   ;;  %vm69_vm11 = vcmask 720544   ;;  %vm75_vm12 = vcmask 687744  }
  0x12   :  { %55 = vrot.lane.b32.xlu0 %v207_v8, %s269_s7  ;;  %61 = vrot.lane.b32.xlu1 %v208_v9, %s270_s8  ;;  %s279_s8 = smov 52   ;;  %vm81_vm13 = vcmask 654944   ;;  %vm87_vm14 = vcmask 622144   ;;  %vm93_vm15 = vcmask 589344   ;;  %vm99_vm0 = vcmask 556544  }
  0x16   :  { %67 = vrot.lane.b32.xlu0 %v209_v11, %s271_s13  ;;  %73 = vrot.lane.b32.xlu1 %v210_v12, %s272_s14  ;;  %s281_s14 = smov 44  }
  0x1a   :  { %79 = vrot.lane.b32.xlu0 %v211_v13, %s273_s19  ;;  %85 = vrot.lane.b32.xlu1 %v212_v14, %s274_s20  ;;  %s283_s20 = smov 36  }
  0x1e   :  { %91 = vrot.lane.b32.xlu0 %v213_v15, %s275_s25  ;;  %97 = vrot.lane.b32.xlu1 %v214_v16, %s276_s26  ;;  %s285_s26 = smov 28  }
  0x22   :  { %103 = vrot.lane.b32.xlu0 %v215_v17, %s277_s2  ;;  %109 = vrot.lane.b32.xlu1 %v216_v18, %s278_s3  ;;  %s287_s3 = smov 20  }
  0x26   :  { %115 = vrot.lane.b32.xlu0 %v217_v19, %s279_s8  ;;  %121 = vrot.lane.b32.xlu1 %v218_v20, %s280_s9  ;;  %s289_s9 = smov 12  }
  0x2a   :  { %127 = vrot.lane.b32.xlu0 %v219_v21, %s281_s14  ;;  %133 = vrot.lane.b32.xlu1 %v220_v22, %s282_s15 }
  0x2e   :  { %139 = vrot.lane.b32.xlu0 %v221_v23, %s283_s20  ;;  %145 = vrot.lane.b32.xlu1 %v222_v24, %s284_s21 }
  0x32   :  { %151 = vrot.lane.b32.xlu0 %v223_v25, %s285_s26  ;;  %157 = vrot.lane.b32.xlu1 %v224_v26, %s286_s27 }
  0x36   :  { %163 = vrot.lane.b32.xlu0 %v225_v27, %s287_s3  ;;  %169 = vrot.lane.b32.xlu1 %v226_v28, %s288_s4 }
  0x3a   :  { %175 = vrot.lane.b32.xlu0 %v227_v29, %s289_s9  ;;  %181 = vrot.lane.b32.xlu1 %v228_v30, %s290_s10 }
  0x3e   :  { %187 = vrot.lane.b32.xlu0 %v229_v31, %s291_s0 }
  0x74   :  { %v8_v32 = vpop.permute.xlu0 %7   ;;  %v20_v33 = vpop.permute.xlu1 %19  }
  0x75   :  { %10 = vst.msk [vmem:[#allocation0] sm:$0x1] %vm9_vm1, %v8_v32   ;;  %vm105_vm1 = vcmask 523744  }
  0x78   :  { %v14_v34 = vpop.permute.xlu0 %13   ;;  %v26_v35 = vpop.permute.xlu1 %25  }
  0x79   :  { %16 = vst.msk [vmem:[#allocation0] sm:$0x1] %vm15_vm2, %v14_v34   ;;  %vm111_vm2 = vcmask 490944  }
  0x7a   :  { %22 = vst.msk [vmem:[#allocation0] sm:$0x1] %vm21_vm3, %v20_v33   ;;  %vm117_vm3 = vcmask 458144  }
  0x7b   :  { %28 = vst.msk [vmem:[#allocation0] sm:$0x1] %vm27_vm4, %v26_v35   ;;  %vm123_vm4 = vcmask 425344  }
  0x7c   :  { %v32_v36 = vpop.permute.xlu0 %31   ;;  %v38_v37 = vpop.permute.xlu1 %37  }
  0x7d   :  { %34 = vst.msk [vmem:[#allocation0] sm:$0x1] %vm33_vm5, %v32_v36   ;;  %vm129_vm5 = vcmask 392544  }
  0x7e   :  { %40 = vst.msk [vmem:[#allocation0] sm:$0x1] %vm39_vm6, %v38_v37   ;;  %vm135_vm6 = vcmask 359744  }
  0x80   :  { %v44_v38 = vpop.permute.xlu0 %43   ;;  %v50_v39 = vpop.permute.xlu1 %49  }
  0x81   :  { %46 = vst.msk [vmem:[#allocation0] sm:$0x1] %vm45_vm7, %v44_v38   ;;  %vm141_vm7 = vcmask 326944  }
  0x82   :  { %52 = vst.msk [vmem:[#allocation0] sm:$0x1] %vm51_vm8, %v50_v39   ;;  %vm147_vm8 = vcmask 294144  }
  0x84   :  { %v56_v40 = vpop.permute.xlu0 %55   ;;  %v62_v41 = vpop.permute.xlu1 %61  }
  0x85   :  { %58 = vst.msk [vmem:[#allocation0] sm:$0x1] %vm57_vm9, %v56_v40   ;;  %vm153_vm9 = vcmask 261344  }
  0x86   :  { %64 = vst.msk [vmem:[#allocation0] sm:$0x1] %vm63_vm10, %v62_v41   ;;  %vm159_vm10 = vcmask 228544  }
  0x88   :  { %v68_v42 = vpop.permute.xlu0 %67   ;;  %v74_v43 = vpop.permute.xlu1 %73  }
  0x89   :  { %70 = vst.msk [vmem:[#allocation0] sm:$0x1] %vm69_vm11, %v68_v42   ;;  %vm165_vm11 = vcmask 195744  }
  0x8a   :  { %76 = vst.msk [vmem:[#allocation0] sm:$0x1] %vm75_vm12, %v74_v43   ;;  %vm171_vm12 = vcmask 162944  }
  0x8c   :  { %v80_v44 = vpop.permute.xlu0 %79   ;;  %v86_v45 = vpop.permute.xlu1 %85  }
  0x8d   :  { %82 = vst.msk [vmem:[#allocation0] sm:$0x1] %vm81_vm13, %v80_v44   ;;  %vm177_vm13 = vcmask 130144  }
  0x8e   :  { %88 = vst.msk [vmem:[#allocation0] sm:$0x1] %vm87_vm14, %v86_v45   ;;  %vm183_vm14 = vcmask 97344  }
  0x90   :  { %v92_v46 = vpop.permute.xlu0 %91   ;;  %v98_v47 = vpop.permute.xlu1 %97  }
  0x91   :  { %94 = vst.msk [vmem:[#allocation0] sm:$0x1] %vm93_vm15, %v92_v46   ;;  %vm189_vm15 = vcmask 64544  }
  0x92   :  { %100 = vst.msk [vmem:[#allocation0] sm:$0x1] %vm99_vm0, %v98_v47  }
  0x94   :  { %v104_v48 = vpop.permute.xlu0 %103   ;;  %v110_v49 = vpop.permute.xlu1 %109  }
  0x95   :  { %106 = vst.msk [vmem:[#allocation0] sm:$0x1] %vm105_vm1, %v104_v48  }
  0x96   :  { %112 = vst.msk [vmem:[#allocation0] sm:$0x1] %vm111_vm2, %v110_v49  }
  0x98   :  { %v116_v50 = vpop.permute.xlu0 %115   ;;  %v122_v51 = vpop.permute.xlu1 %121  }
  0x99   :  { %118 = vst.msk [vmem:[#allocation0] sm:$0x1] %vm117_vm3, %v116_v50  }
  0x9a   :  { %124 = vst.msk [vmem:[#allocation0] sm:$0x1] %vm123_vm4, %v122_v51  }
  0x9c   :  { %v128_v52 = vpop.permute.xlu0 %127   ;;  %v134_v53 = vpop.permute.xlu1 %133  }
  0x9d   :  { %130 = vst.msk [vmem:[#allocation0] sm:$0x1] %vm129_vm5, %v128_v52  }
  0x9e   :  { %136 = vst.msk [vmem:[#allocation0] sm:$0x1] %vm135_vm6, %v134_v53  }
  0xa0   :  { %v140_v54 = vpop.permute.xlu0 %139   ;;  %v146_v55 = vpop.permute.xlu1 %145  }
  0xa1   :  { %142 = vst.msk [vmem:[#allocation0] sm:$0x1] %vm141_vm7, %v140_v54  }
  0xa2   :  { %148 = vst.msk [vmem:[#allocation0] sm:$0x1] %vm147_vm8, %v146_v55  }
  0xa4   :  { %v152_v56 = vpop.permute.xlu0 %151   ;;  %v158_v57 = vpop.permute.xlu1 %157  }
  0xa5   :  { %154 = vst.msk [vmem:[#allocation0] sm:$0x1] %vm153_vm9, %v152_v56  }
  0xa6   :  { %160 = vst.msk [vmem:[#allocation0] sm:$0x1] %vm159_vm10, %v158_v57  }
  0xa8   :  { %v164_v58 = vpop.permute.xlu0 %163   ;;  %v170_v59 = vpop.permute.xlu1 %169  }
  0xa9   :  { %166 = vst.msk [vmem:[#allocation0] sm:$0x1] %vm165_vm11, %v164_v58  }
  0xaa   :  { %172 = vst.msk [vmem:[#allocation0] sm:$0x1] %vm171_vm12, %v170_v59  }
  0xac   :  { %v176_v60 = vpop.permute.xlu0 %175   ;;  %v182_v61 = vpop.permute.xlu1 %181  }
  0xad   :  { %178 = vst.msk [vmem:[#allocation0] sm:$0x1] %vm177_vm13, %v176_v60  }
  0xae   :  { %184 = vst.msk [vmem:[#allocation0] sm:$0x1] %vm183_vm14, %v182_v61  }
  0xb0   :  { %v188_v62 = vpop.permute.xlu0 %187  }
  0xb1   :  { %190 = vst.msk [vmem:[#allocation0] sm:$0x1] %vm189_vm15, %v188_v62  }
  0xb8   :  { %v195_v63 = vld [vmem:[#allocation0] sm:$0x1] }
  0xb9   :  { %198 = vst [vmem:[%s402_s1] sm:$0x1] %v195_v63 }

// kernel: net_forward.1
= control target key start
LH: loop header
LB: loop body
LE: loop exit
PB: predicated region body
PF: predicated region fallthrough
CT: control target
= control target key end

     0   :  { %v1000_v0 = vmov 0.0   ;;  %vm1001_vm0 = vmmov 0   ;;  %s1442_s0 = inlined_call_operand.vmem [shape: f32[128,128], index: 0, kind: input, shape index: {}]   ;;  %s1443_s2 = inlined_call_operand.vmem [shape: f32[8,128], index: 2, kind: input, shape index: {}]   ;;  %s1444_s1 = inlined_call_operand.vmem [shape: f32[1,128], index: 1, kind: input, shape index: {}]   ;;  %s1445_s3 = inlined_call_operand.vmem [shape: f32[8,128], index: 3, kind: output, shape index: {}]  }
   0x1   :  { %788 = vmatprep.subr.mxu0 %v1000_v0  ;;  %v30_v1 = vld [vmem:[%s1442_s0 + $0x78] sm:$0xff]  ;;  %v29_v2 = vld [vmem:[%s1442_s0 + $0x70] sm:$0xff]  ;;  %v28_v3 = vld [vmem:[%s1442_s0 + $0x68] sm:$0xff]  ;;  %823 = vmatprep.subr.mxu1 %v1000_v0 }
   0x2   :  { %v1033_v4 = vand.u32 4294901760, %v30_v1  ;;  %v1035_v5 = vand.u32 4294901760, %v29_v2  ;;  %v1037_v6 = vand.u32 4294901760, %v28_v3  ;;  %v27_v7 = vld [vmem:[%s1442_s0 + $0x60] sm:$0xff]  ;;  %v26_v8 = vld [vmem:[%s1442_s0 + $0x58] sm:$0xff]  ;;  %v25_v9 = vld [vmem:[%s1442_s0 + $0x50] sm:$0xff]  ;;  %820 = vmatprep.mubr.msk.f32.mxu0 %vm1001_vm0, %v1000_v0  ;;  %855 = vmatprep.mubr.msk.f32.mxu1 %vm1001_vm0, %v1000_v0 }
   0x3   :  { %v1052_v10 = vand.u32 4294901760, %v27_v7  ;;  %v1054_v11 = vand.u32 4294901760, %v26_v8  ;;  %v1056_v12 = vand.u32 4294901760, %v25_v9  ;;  %v24_v13 = vld [vmem:[%s1442_s0 + $0x48] sm:$0xff]  ;;  %v23_v14 = vld [vmem:[%s1442_s0 + $0x40] sm:$0xff]  ;;  %v22_v19 = vld [vmem:[%s1442_s0 + $0x38] sm:$0xff] }
   0x4   :  { %789 = vmatpush3.msra.mxu0 %v1033_v4  ;;  %v1066_v15 = vsub.f32 %v30_v1, %v1033_v4  ;;  %v1069_v16 = vsub.f32 %v29_v2, %v1035_v5  ;;  %v1071_v17 = vand.u32 4294901760, %v24_v13  ;;  %v1074_v18 = vsub.f32 %v28_v3, %v1037_v6  ;;  %v21_v26 = vld [vmem:[%s1442_s0 + $0x30] sm:$0xff]  ;;  %v20_v36 = vld [vmem:[%s1442_s0 + $0x28] sm:$0xff]  ;;  %v19_v41 = vld [vmem:[%s1442_s0 + $0x20] sm:$0xff] }
   0x5   :  { %790 = vmatprep.subr.mxu0 %v1000_v0  ;;  %v1081_v20 = vsub.f32 %v27_v7, %v1052_v10  ;;  %v1084_v21 = vsub.f32 %v26_v8, %v1054_v11  ;;  %v1090_v25 = vand.u32 4294901760, %v23_v14  ;;  %v1097_v28 = vand.u32 4294901760, %v22_v19  ;;  %v18_v49 = vld [vmem:[%s1442_s0 + $0x18] sm:$0xff]  ;;  %v14_v50 = vld [vmem:[%s1443_s2] sm:$0xff]  ;;  %v17_v54 = vld [vmem:[%s1442_s0 + $0x10] sm:$0xff] }
   0x6   :  { %791 = vmatpush3.msra.mxu0 %v1035_v5  ;;  %v132_v22 = vand.u32 4294901760, %v1066_v15  ;;  %v139_v23 = vand.u32 4294901760, %v1069_v16  ;;  %v146_v24 = vand.u32 4294901760, %v1074_v18  ;;  %v1101_v30 = vsub.f32 %v25_v9, %v1056_v12  ;;  %v16_v60 = vld [vmem:[%s1442_s0 + $0x8] sm:$0xff]  ;;  %v15_v7 = vld [vmem:[%s1442_s0] sm:$0xff] }
   0x7   :  { %792 = vmatprep.subr.mxu0 %v1000_v0  ;;  %v153_v27 = vand.u32 4294901760, %v1081_v20  ;;  %v160_v29 = vand.u32 4294901760, %v1084_v21  ;;  %v1114_v34 = vsub.f32 %v24_v13, %v1071_v17  ;;  %v1117_v35 = vand.u32 4294901760, %v21_v26 }
   0x8   :  { %793 = vmatpush3.msra.mxu0 %v1037_v6  ;;  %v133_v31 = vsub.f32 %v1066_v15, %v132_v22  ;;  %v140_v32 = vsub.f32 %v1069_v16, %v139_v23  ;;  %v147_v33 = vsub.f32 %v1074_v18, %v146_v24  ;;  %v167_v40 = vand.u32 4294901760, %v1101_v30 }
   0x9   :  { %794 = vmatprep.subr.mxu0 %v1000_v0  ;;  %v154_v39 = vsub.f32 %v1081_v20, %v153_v27  ;;  %v161_v42 = vsub.f32 %v1084_v21, %v160_v29  ;;  %v1135_v43 = vsub.f32 %v23_v14, %v1090_v25  ;;  %v1138_v45 = vand.u32 4294901760, %v20_v36 }
   0xa   :  { %795 = vmatpush3.msra.mxu0 %v1052_v10  ;;  %v134_v37 = vand.u32 4294901760, %v133_v31  ;;  %v141_v38 = vand.u32 4294901760, %v140_v32  ;;  %v148_v44 = vand.u32 4294901760, %v147_v33  ;;  %v174_v46 = vand.u32 4294901760, %v1114_v34 }
   0xb   :  { %796 = vmatprep.subr.mxu0 %v1000_v0  ;;  %v1142_v47 = vsub.f32 %v22_v19, %v1097_v28  ;;  %v1146_v48 = vand.u32 4294901760, %v19_v41  ;;  %v155_v51 = vand.u32 4294901760, %v154_v39  ;;  %v168_v52 = vsub.f32 %v1101_v30, %v167_v40 }
   0xc   :  { %797 = vmatpush3.msra.mxu0 %v1054_v11  ;;  %824 = vmatpush3.msra.mxu1 %v134_v37  ;;  %v181_v53 = vand.u32 4294901760, %v1135_v43  ;;  %v1163_v55 = vsub.f32 %v21_v26, %v1117_v35  ;;  %v162_v56 = vand.u32 4294901760, %v161_v42  ;;  %v175_v58 = vsub.f32 %v1114_v34, %v174_v46 }
   0xd   :  { %798 = vmatprep.subr.mxu0 %v1000_v0  ;;  %825 = vmatprep.subr.mxu1 %v1000_v0  ;;  %v188_v57 = vand.u32 4294901760, %v1142_v47  ;;  %v1172_v59 = vand.u32 4294901760, %v18_v49  ;;  %v1178_v61 = vsub.f32 %v20_v36, %v1138_v45  ;;  %v1180_v62 = vand.u32 4294901760, %v14_v50 }
   0xe   :  { %799 = vmatpush3.msra.mxu0 %v1056_v12  ;;  %826 = vmatpush3.msra.mxu1 %v141_v38  ;;  %v1184_v63 = vand.u32 4294901760, %v17_v54  ;;  %v169_v1 = vand.u32 4294901760, %v168_v52  ;;  %v182_v2 = vsub.f32 %v1135_v43, %v181_v53  ;;  %v195_v3 = vand.u32 4294901760, %v1163_v55 }
   0xf   :  { %800 = vmatprep.subr.mxu0 %v1000_v0  ;;  %827 = vmatprep.subr.mxu1 %v1000_v0  ;;  %v1195_v8 = vsub.f32 %v19_v41, %v1146_v48  ;;  %v189_v9 = vsub.f32 %v1142_v47, %v188_v57  ;;  %v1202_v13 = vand.u32 4294901760, %v16_v60  ;;  %v176_v14 = vand.u32 4294901760, %v175_v58 }
  0x10   :  { %801 = vmatpush3.msra.mxu0 %v1071_v17  ;;  %828 = vmatpush3.msra.mxu1 %v148_v44  ;;  %v202_v19 = vand.u32 4294901760, %v1178_v61  ;;  %v1207_v26 = vsub.f32 %v14_v50, %v1180_v62  ;;  %v1210_v31 = vsub.f32 %v18_v49, %v1172_v59  ;;  %v1214_v32 = vand.u32 4294901760, %v15_v7 }
  0x11   :  { %802 = vmatprep.subr.mxu0 %v1000_v0  ;;  %829 = vmatprep.subr.mxu1 %v1000_v0  ;;  %v183_v33 = vand.u32 4294901760, %v182_v2  ;;  %v196_v36 = vsub.f32 %v1163_v55, %v195_v3  ;;  %v209_v37 = vand.u32 4294901760, %v1195_v8  ;;  %v1222_v38 = vsub.f32 %v17_v54, %v1184_v63 }
  0x12   :  { %803 = vmatpush3.msra.mxu0 %v1090_v25  ;;  %830 = vmatpush3.msra.mxu1 %v155_v51  ;;  %v190_v39 = vand.u32 4294901760, %v189_v9  ;;  %v203_v41 = vsub.f32 %v1178_v61, %v202_v19  ;;  %v121_v42 = vand.u32 4294901760, %v1207_v26  ;;  %v216_v44 = vand.u32 4294901760, %v1210_v31 }
  0x13   :  { %804 = vmatprep.subr.mxu0 %v1000_v0  ;;  %831 = vmatprep.subr.mxu1 %v1000_v0  ;;  %v1233_v49 = vsub.f32 %v16_v60, %v1202_v13  ;;  %v197_v50 = vand.u32 4294901760, %v196_v36  ;;  %v210_v51 = vsub.f32 %v1195_v8, %v209_v37  ;;  %v223_v52 = vand.u32 4294901760, %v1222_v38 }
  0x14   :  { %805 = vmatpush3.msra.mxu0 %v1097_v28  ;;  %832 = vmatpush3.msra.mxu1 %v162_v56  ;;  %v1243_v54 = vsub.f32 %v15_v7, %v1214_v32  ;;  %v204_v56 = vand.u32 4294901760, %v203_v41  ;;  %v122_v58 = vsub.f32 %v1207_v26, %v121_v42  ;;  %v217_v60 = vsub.f32 %v1210_v31, %v216_v44 }
  0x15   :  { %806 = vmatprep.subr.mxu0 %v1000_v0  ;;  %833 = vmatprep.subr.mxu1 %v1000_v0  ;;  %v211_v2 = vand.u32 4294901760, %v210_v51  ;;  %v224_v7 = vsub.f32 %v1222_v38, %v223_v52 }
  0x16   :  { %807 = vmatpush3.msra.mxu0 %v1117_v35  ;;  %834 = vmatpush3.msra.mxu1 %v169_v1  ;;  %v230_v1 = vand.u32 4294901760, %v1233_v49  ;;  %v237_v9 = vand.u32 4294901760, %v1243_v54 }
  0x17   :  { %808 = vmatprep.subr.mxu0 %v1000_v0  ;;  %835 = vmatprep.subr.mxu1 %v1000_v0 }
  0x18   :  { %809 = vmatpush3.msra.mxu0 %v1138_v45  ;;  %836 = vmatpush3.msra.mxu1 %v176_v14  ;;  %v123_v14 = vand.u32 4294901760, %v122_v58  ;;  %v231_v36 = vsub.f32 %v1233_v49, %v230_v1  ;;  %v238_v41 = vsub.f32 %v1243_v54, %v237_v9 }
  0x19   :  { %810 = vmatprep.subr.mxu0 %v1000_v0  ;;  %837 = vmatprep.subr.mxu1 %v1000_v0 }
  0x1a   :  { %811 = vmatpush3.msra.mxu0 %v1146_v48  ;;  %838 = vmatpush3.msra.mxu1 %v183_v33  ;;  %v218_v33 = vand.u32 4294901760, %v217_v60  ;;  %v239_v51 = vand.u32 4294901760, %v238_v41 }
  0x1b   :  { %812 = vmatprep.subr.mxu0 %v1000_v0  ;;  %839 = vmatprep.subr.mxu1 %v1000_v0 }
  0x1c   :  { %813 = vmatpush3.msra.mxu0 %v1172_v59  ;;  %840 = vmatpush3.msra.mxu1 %v190_v39  ;;  %v225_v39 = vand.u32 4294901760, %v224_v7 }
  0x1d   :  { %814 = vmatprep.subr.mxu0 %v1000_v0  ;;  %841 = vmatprep.subr.mxu1 %v1000_v0 }
  0x1e   :  { %815 = vmatpush3.msra.mxu0 %v1184_v63  ;;  %842 = vmatpush3.msra.mxu1 %v197_v50  ;;  %v232_v50 = vand.u32 4294901760, %v231_v36 }
  0x1f   :  { %816 = vmatprep.subr.mxu0 %v1000_v0  ;;  %843 = vmatprep.subr.mxu1 %v1000_v0 }
  0x20   :  { %817 = vmatpush3.msra.mxu0 %v1202_v13  ;;  %844 = vmatpush3.msra.mxu1 %v204_v56 }
  0x21   :  { %818 = vmatprep.subr.mxu0 %v1000_v0  ;;  %845 = vmatprep.subr.mxu1 %v1000_v0 }
  0x22   :  { %819 = vmatpush3.msra.mxu0 %v1214_v32  ;;  %846 = vmatpush3.msra.mxu1 %v211_v2 }
  0x23   :  { %847 = vmatprep.subr.mxu1 %v1000_v0  ;;  %858 = vmatprep.subr.mxu0 %v1000_v0 }
  0x24   :  { %821 = vmatmul.mubr.f32.vlgmr.msra.gmra.mxu0 %v123_v14  ;;  %848 = vmatpush3.msra.mxu1 %v218_v33 }
  0x25   :  { %859 = vmatpush3.msra.mxu0 %v1066_v15  ;;  %849 = vmatprep.subr.mxu1 %v1000_v0 }
  0x26   :  { %860 = vmatprep.subr.mxu0 %v1000_v0  ;;  %850 = vmatpush3.msra.mxu1 %v225_v39 }
  0x27   :  { %861 = vmatpush3.msra.mxu0 %v1069_v16  ;;  %851 = vmatprep.subr.mxu1 %v1000_v0 }
  0x28   :  { %862 = vmatprep.subr.mxu0 %v1000_v0  ;;  %852 = vmatpush3.msra.mxu1 %v232_v50 }
  0x29   :  { %863 = vmatpush3.msra.mxu0 %v1074_v18  ;;  %853 = vmatprep.subr.mxu1 %v1000_v0 }
  0x2a   :  { %864 = vmatprep.subr.mxu0 %v1000_v0  ;;  %854 = vmatpush3.msra.mxu1 %v239_v51 }
  0x2b   :  { %865 = vmatpush3.msra.mxu0 %v1081_v20  ;;  %856 = vmatmul.mubr.f32.vlgmr.msra.gmra.mxu1 %v1180_v62 }
  0x2c   :  { %866 = vmatprep.subr.mxu0 %v1000_v0  ;;  %893 = vmatprep.subr.mxu1 %v1000_v0 }
  0x2d   :  { %867 = vmatpush3.msra.mxu0 %v1084_v21  ;;  %894 = vmatpush3.msra.mxu1 %v1033_v4 }
  0x2e   :  { %868 = vmatprep.subr.mxu0 %v1000_v0  ;;  %895 = vmatprep.subr.mxu1 %v1000_v0 }
  0x2f   :  { %869 = vmatpush3.msra.mxu0 %v1101_v30  ;;  %896 = vmatpush3.msra.mxu1 %v1035_v5 }
  0x30   :  { %870 = vmatprep.subr.mxu0 %v1000_v0  ;;  %897 = vmatprep.subr.mxu1 %v1000_v0 }
  0x31   :  { %871 = vmatpush3.msra.mxu0 %v1114_v34  ;;  %898 = vmatpush3.msra.mxu1 %v1037_v6 }
  0x32   :  { %872 = vmatprep.subr.mxu0 %v1000_v0  ;;  %899 = vmatprep.subr.mxu1 %v1000_v0 }
  0x33   :  { %873 = vmatpush3.msra.mxu0 %v1135_v43  ;;  %900 = vmatpush3.msra.mxu1 %v1052_v10 }
  0x34   :  { %874 = vmatprep.subr.mxu0 %v1000_v0  ;;  %901 = vmatprep.subr.mxu1 %v1000_v0 }
  0x35   :  { %875 = vmatpush3.msra.mxu0 %v1142_v47  ;;  %902 = vmatpush3.msra.mxu1 %v1054_v11 }
  0x36   :  { %876 = vmatprep.subr.mxu0 %v1000_v0  ;;  %903 = vmatprep.subr.mxu1 %v1000_v0 }
  0x37   :  { %877 = vmatpush3.msra.mxu0 %v1163_v55  ;;  %904 = vmatpush3.msra.mxu1 %v1056_v12 }
  0x38   :  { %878 = vmatprep.subr.mxu0 %v1000_v0  ;;  %905 = vmatprep.subr.mxu1 %v1000_v0 }
  0x39   :  { %879 = vmatpush3.msra.mxu0 %v1178_v61  ;;  %906 = vmatpush3.msra.mxu1 %v1071_v17 }
  0x3a   :  { %880 = vmatprep.subr.mxu0 %v1000_v0  ;;  %907 = vmatprep.subr.mxu1 %v1000_v0 }
  0x3b   :  { %881 = vmatpush3.msra.mxu0 %v1195_v8  ;;  %908 = vmatpush3.msra.mxu1 %v1090_v25 }
  0x3c   :  { %882 = vmatprep.subr.mxu0 %v1000_v0  ;;  %909 = vmatprep.subr.mxu1 %v1000_v0 }
  0x3d   :  { %883 = vmatpush3.msra.mxu0 %v1210_v31  ;;  %910 = vmatpush3.msra.mxu1 %v1097_v28 }
  0x3e   :  { %884 = vmatprep.subr.mxu0 %v1000_v0  ;;  %911 = vmatprep.subr.mxu1 %v1000_v0 }
  0x3f   :  { %885 = vmatpush3.msra.mxu0 %v1222_v38  ;;  %912 = vmatpush3.msra.mxu1 %v1117_v35 }
  0x40   :  { %886 = vmatprep.subr.mxu0 %v1000_v0  ;;  %913 = vmatprep.subr.mxu1 %v1000_v0 }
  0x41   :  { %887 = vmatpush3.msra.mxu0 %v1233_v49  ;;  %914 = vmatpush3.msra.mxu1 %v1138_v45 }
  0x42   :  { %888 = vmatprep.subr.mxu0 %v1000_v0  ;;  %915 = vmatprep.subr.mxu1 %v1000_v0 }
  0x43   :  { %889 = vmatpush3.msra.mxu0 %v1243_v54  ;;  %890 = vmatprep.mubr.msk.f32.mxu0 %vm1001_vm0, %v1000_v0 }
  0x44   :  { %916 = vmatpush3.msra.mxu1 %v1146_v48  ;;  %891 = vmatmul.mubr.f32.vlgmr.msra.gmra.mxu0 %v1207_v26 }
  0x45   :  { %917 = vmatprep.subr.mxu1 %v1000_v0  ;;  %928 = vmatprep.subr.mxu0 %v1000_v0 }
  0x46   :  { %918 = vmatpush3.msra.mxu1 %v1172_v59  ;;  %929 = vmatpush3.msra.mxu0 %v132_v22 }
  0x47   :  { %919 = vmatprep.subr.mxu1 %v1000_v0  ;;  %930 = vmatprep.subr.mxu0 %v1000_v0 }
  0x48   :  { %920 = vmatpush3.msra.mxu1 %v1184_v63  ;;  %931 = vmatpush3.msra.mxu0 %v139_v23 }
  0x49   :  { %921 = vmatprep.subr.mxu1 %v1000_v0  ;;  %932 = vmatprep.subr.mxu0 %v1000_v0 }
  0x4a   :  { %922 = vmatpush3.msra.mxu1 %v1202_v13  ;;  %933 = vmatpush3.msra.mxu0 %v146_v24 }
  0x4b   :  { %923 = vmatprep.subr.mxu1 %v1000_v0  ;;  %934 = vmatprep.subr.mxu0 %v1000_v0 }
  0x4c   :  { %924 = vmatpush3.msra.mxu1 %v1214_v32  ;;  %925 = vmatprep.mubr.msk.f32.mxu1 %vm1001_vm0, %v1000_v0 }
  0x4d   :  { %935 = vmatpush3.msra.mxu0 %v153_v27  ;;  %926 = vmatmul.mubr.f32.vlgmr.msra.gmra.mxu1 %v121_v42 }
  0x4e   :  { %936 = vmatprep.subr.mxu0 %v1000_v0  ;;  %963 = vmatprep.subr.mxu1 %v1000_v0 }
  0x4f   :  { %937 = vmatpush3.msra.mxu0 %v160_v29  ;;  %964 = vmatpush3.msra.mxu1 %v1033_v4 }
  0x50   :  { %938 = vmatprep.subr.mxu0 %v1000_v0  ;;  %965 = vmatprep.subr.mxu1 %v1000_v0 }
  0x51   :  { %939 = vmatpush3.msra.mxu0 %v167_v40  ;;  %966 = vmatpush3.msra.mxu1 %v1035_v5 }
  0x52   :  { %940 = vmatprep.subr.mxu0 %v1000_v0  ;;  %967 = vmatprep.subr.mxu1 %v1000_v0 }
  0x53   :  { %941 = vmatpush3.msra.mxu0 %v174_v46  ;;  %968 = vmatpush3.msra.mxu1 %v1037_v6 }
  0x54   :  { %942 = vmatprep.subr.mxu0 %v1000_v0  ;;  %969 = vmatprep.subr.mxu1 %v1000_v0 }
  0x55   :  { %943 = vmatpush3.msra.mxu0 %v181_v53  ;;  %970 = vmatpush3.msra.mxu1 %v1052_v10 }
  0x56   :  { %944 = vmatprep.subr.mxu0 %v1000_v0  ;;  %971 = vmatprep.subr.mxu1 %v1000_v0 }
  0x57   :  { %945 = vmatpush3.msra.mxu0 %v188_v57  ;;  %972 = vmatpush3.msra.mxu1 %v1054_v11 }
  0x58   :  { %946 = vmatprep.subr.mxu0 %v1000_v0  ;;  %973 = vmatprep.subr.mxu1 %v1000_v0 }
  0x59   :  { %947 = vmatpush3.msra.mxu0 %v195_v3  ;;  %974 = vmatpush3.msra.mxu1 %v1056_v12 }
  0x5a   :  { %948 = vmatprep.subr.mxu0 %v1000_v0  ;;  %975 = vmatprep.subr.mxu1 %v1000_v0 }
  0x5b   :  { %949 = vmatpush3.msra.mxu0 %v202_v19  ;;  %976 = vmatpush3.msra.mxu1 %v1071_v17  ;;  %v685_v17 = vld [vmem:[%s1444_s1] ss:$0 sm:$0xff] }
  0x5c   :  { %950 = vmatprep.subr.mxu0 %v1000_v0  ;;  %977 = vmatprep.subr.mxu1 %v1000_v0 }
  0x5d   :  { %951 = vmatpush3.msra.mxu0 %v209_v37  ;;  %978 = vmatpush3.msra.mxu1 %v1090_v25 }
  0x5e   :  { %952 = vmatprep.subr.mxu0 %v1000_v0  ;;  %979 = vmatprep.subr.mxu1 %v1000_v0 }
  0x5f   :  { %953 = vmatpush3.msra.mxu0 %v216_v44  ;;  %980 = vmatpush3.msra.mxu1 %v1097_v28 }
  0x60   :  { %954 = vmatprep.subr.mxu0 %v1000_v0  ;;  %981 = vmatprep.subr.mxu1 %v1000_v0 }
  0x61   :  { %955 = vmatpush3.msra.mxu0 %v223_v52  ;;  %982 = vmatpush3.msra.mxu1 %v1117_v35 }
  0x62   :  { %956 = vmatprep.subr.mxu0 %v1000_v0  ;;  %983 = vmatprep.subr.mxu1 %v1000_v0 }
  0x63   :  { %957 = vmatpush3.msra.mxu0 %v230_v1  ;;  %984 = vmatpush3.msra.mxu1 %v1138_v45 }
  0x64   :  { %958 = vmatprep.subr.mxu0 %v1000_v0  ;;  %985 = vmatprep.subr.mxu1 %v1000_v0 }
  0x65   :  { %959 = vmatpush3.msra.mxu0 %v237_v9  ;;  %960 = vmatprep.mubr.msk.f32.mxu0 %vm1001_vm0, %v1000_v0 }
  0x66   :  { %986 = vmatpush3.msra.mxu1 %v1146_v48  ;;  %961 = vmatmul.mubr.f32.vlgmr.msra.gmra.mxu0 %v1180_v62 }
  0x67   :  { %987 = vmatprep.subr.mxu1 %v1000_v0  ;;  %995 = vmatprep.mubr.msk.f32.mxu1 %vm1001_vm0, %v1000_v0 }
  0x68   :  { %988 = vmatpush3.msra.mxu1 %v1172_v59 }
  0x69   :  { %989 = vmatprep.subr.mxu1 %v1000_v0 }
  0x6a   :  { %990 = vmatpush3.msra.mxu1 %v1184_v63 }
  0x6b   :  { %991 = vmatprep.subr.mxu1 %v1000_v0 }
  0x6c   :  { %992 = vmatpush3.msra.mxu1 %v1202_v13 }
  0x6d   :  { %993 = vmatprep.subr.mxu1 %v1000_v0 }
  0x6e   :  { %994 = vmatpush3.msra.mxu1 %v1214_v32 }
  0x6f   :  { %996 = vmatmul.mubr.f32.vlgmr.msra.gmra.mxu1 %v1180_v62 }
  0xe4   :  { %v125_v4 = vpop.f32.mrf.mxu0 }
  0xe5   :  { %v126_v18 = vadd.f32 %v685_v17, %v125_v4 }
  0xe6   :  { %v822_v5 = vpop.f32.mrf.mxu0 }
  0xeb   :  { %v276_v6 = vpop.f32.mrf.mxu1 }
  0xec   :  { %v277_v21 = vadd.f32 %v276_v6, %v126_v18 }
  0xed   :  { %v857_v10 = vpop.f32.mrf.mxu1 }
 0x104   :  { %v380_v11 = vpop.f32.mrf.mxu0 }
 0x105   :  { %v381_v22 = vadd.f32 %v380_v11, %v277_v21 }
 0x106   :  { %v892_v12 = vpop.f32.mrf.mxu0 }
 0x10d   :  { %v469_v15 = vpop.f32.mrf.mxu1 }
 0x10e   :  { %v470_v23 = vadd.f32 %v469_v15, %v381_v22 }
 0x10f   :  { %v927_v16 = vpop.f32.mrf.mxu1 }
 0x126   :  { %v588_v20 = vpop.f32.mrf.mxu0 }
 0x127   :  { %v589_v24 = vadd.f32 %v588_v20, %v470_v23 }
 0x128   :  { %v962_v0 = vpop.f32.mrf.mxu0 }
 0x12f   :  { %v675_v25 = vpop.f32.mrf.mxu1 }
 0x130   :  { %v676_v27 = vadd.f32 %v675_v25, %v589_v24 }
 0x131   :  { %v997_v28 = vpop.f32.mrf.mxu1 }
 0x132   :  { %v679_v29 = vmax.f32 %v676_v27, 0.0 }
 0x134   :  { %680 = vst [vmem:[%s1445_s3] sm:$0xff] %v679_v29 }

</bundles_post_ra>
